<compile_context>
chip_gen: v7x
topology: tpu7x:2x2x1
jax: 0.10.0
libtpu: 0.0.40
codegen_flags: <defaults>
</compile_context>

<pallas_src>
import jax
import jax.numpy as jnp
from jax.experimental import pallas as pl
from jax.experimental.pallas import tpu as pltpu

_SUBLANE = 8  # f32 sublane granularity for the batch (second-to-last) dim


def _round_up(x, m):
    return (x + m - 1) // m * m


def _cdiv(a, b):
    return (a + b - 1) // b


# ----------------------------------------------------------------------------
# Kernel
# ----------------------------------------------------------------------------
def _dqn_kernel(x_ref,
                w1_ref, b1_ref,
                w2_ref, b2_ref,
                w3_ref, b3_ref,
                w4_ref, b4_ref,
                out_ref):
    x = x_ref[...]

    # fc1 + ReLU   (state_dim -> 128)
    h = jnp.dot(x, w1_ref[...], preferred_element_type=jnp.float32) + b1_ref[...]
    h = jnp.maximum(h, 0.0)

    # fc2 + ReLU   (128 -> 64)
    h = jnp.dot(h, w2_ref[...], preferred_element_type=jnp.float32) + b2_ref[...]
    h = jnp.maximum(h, 0.0)

    # fc3 + ReLU   (64 -> 32)
    h = jnp.dot(h, w3_ref[...], preferred_element_type=jnp.float32) + b3_ref[...]
    h = jnp.maximum(h, 0.0)

    # out          (32 -> action_dim), no activation
    out_ref[...] = (jnp.dot(h, w4_ref[...], preferred_element_type=jnp.float32)
                    + b4_ref[...]).astype(out_ref.dtype)


# ----------------------------------------------------------------------------
# Params
# ----------------------------------------------------------------------------
def init_params(key, state_dim, action_dim):
    """nn.Linear-style init U(-1/sqrt(fan_in), 1/sqrt(fan_in)).

    Weights are stored pre-transposed as (in_features, out_features) so the
    kernel computes y = x @ W + b  ==  PyTorch's x @ W.T + b.
    """
    dims = [(state_dim, 128), (128, 64), (64, 32), (32, action_dim)]
    params = {}
    for i, (fan_in, fan_out) in enumerate(dims, start=1):
        key, kw, kb = jax.random.split(key, 3)
        bound = 1.0 / jnp.sqrt(jnp.float32(fan_in))
        params[f"w{i}"] = jax.random.uniform(
            kw, (fan_in, fan_out), jnp.float32, minval=-bound, maxval=bound)
        params[f"b{i}"] = jax.random.uniform(
            kb, (1, fan_out), jnp.float32, minval=-bound, maxval=bound)
    return params


# ----------------------------------------------------------------------------
# Forward
# ----------------------------------------------------------------------------
def _choose_batch_tile(batch):
    # Tiny / action-selection batches: single grid step, minimal latency.
    if batch <= 256:
        return _round_up(max(batch, _SUBLANE), _SUBLANE)
    # Replay-buffer batches: cap tiles near 2048 rows, keep the grid length
    # >= 2 and even (so both v7x TensorCores get equal work), and size the
    # tile to B so batch padding stays minimal for awkward sizes.
    n_tiles = max(2, _cdiv(batch, 2048))
    n_tiles = _round_up(n_tiles, 2)
    return _round_up(_cdiv(batch, n_tiles), _SUBLANE)


@jax.jit
def dqn_forward(x, params):
    """x: (B, state_dim) f32; params: output of init_params() (no padding)."""
    B, state_dim = x.shape
    action_dim = params["w4"].shape[1]

    tb = _choose_batch_tile(B)
    bp = _round_up(B, tb)

    xp = jnp.pad(x, ((0, bp - B), (0, 0))) if bp != B else x

    operands = (xp,
                params["w1"], params["b1"],
                params["w2"], params["b2"],
                params["w3"], params["b3"],
                params["w4"], params["b4"])

    # x / out tiled on the batch axis; weights & biases ride along as
    # full-array blocks (constant index_map) and stay VMEM-resident.
    x_spec = pl.BlockSpec((tb, state_dim), lambda i: (i, 0))
    const_spec = lambda arr: pl.BlockSpec(arr.shape, lambda i: (0, 0))

    out = pl.pallas_call(
        _dqn_kernel,
        out_shape=jax.ShapeDtypeStruct((bp, action_dim), jnp.float32),
        grid=(bp // tb,),
        in_specs=[x_spec] + [const_spec(a) for a in operands[1:]],
        out_specs=pl.BlockSpec((tb, action_dim), lambda i: (i, 0)),
        compiler_params=pltpu.CompilerParams(
            dimension_semantics=("parallel",)),
    )(*operands)

    return out[:B] if bp != B else out


# ----------------------------------------------------------------------------
# Reference (plain XLA)
# ----------------------------------------------------------------------------
def reference_forward(x, params):
    h = jnp.maximum(x @ params["w1"] + params["b1"], 0.0)
    h = jnp.maximum(h @ params["w2"] + params["b2"], 0.0)
    h = jnp.maximum(h @ params["w3"] + params["b3"], 0.0)
    return h @ params["w4"] + params["b4"]


# TODO(synk): DQNNetwork.save() (torch checkpoint I/O) has no kernel equivalent.

if __name__ == "__main__":
    STATE_DIM, ACTION_DIM = 16, 4

    key = jax.random.PRNGKey(0)
    key, kp = jax.random.split(key)
    params = init_params(kp, STATE_DIM, ACTION_DIM)

    # Small (action-selection style) batch: single grid step.
    key, kx = jax.random.split(key)
    x_small = jax.random.normal(kx, (2, STATE_DIM), jnp.float32)
    out_small = jax.block_until_ready(dqn_forward(x_small, params))
    ref_small = reference_forward(x_small, params)
    assert out_small.shape == (2, ACTION_DIM)
    assert jnp.allclose(out_small, ref_small, atol=1e-4, rtol=1e-4)

    # Replay-buffer style batch: 2 even grid steps (both TCs on v7x).
    key, kx = jax.random.split(key)
    x_big = jax.random.normal(kx, (1024, STATE_DIM), jnp.float32)
    out_big = jax.block_until_ready(dqn_forward(x_big, params))
    ref_big = reference_forward(x_big, params)
    assert out_big.shape == (1024, ACTION_DIM)
    assert jnp.allclose(out_big, ref_big, atol=1e-4, rtol=1e-4)

    # Awkward batch size: tile choice minimizes batch padding (520 -> 2x264).
    key, kx = jax.random.split(key)
    x_odd = jax.random.normal(kx, (520, STATE_DIM), jnp.float32)
    out_odd = jax.block_until_ready(dqn_forward(x_odd, params))
    ref_odd = reference_forward(x_odd, params)
    assert out_odd.shape == (520, ACTION_DIM)
    assert jnp.allclose(out_odd, ref_odd, atol=1e-4, rtol=1e-4)

    print("KERNEL_OK")
</pallas_src>

<mosaic_0001>
module attributes {stable_mosaic.version = 11 : i64} {
  func.func @_dqn_kernel(%arg0: i32, %arg1: memref<8x16xf32, #tpu.memory_space<vmem>>, %arg2: memref<16x128xf32, #tpu.memory_space<vmem>>, %arg3: memref<1x128xf32, #tpu.memory_space<vmem>>, %arg4: memref<128x64xf32, #tpu.memory_space<vmem>>, %arg5: memref<1x64xf32, #tpu.memory_space<vmem>>, %arg6: memref<64x32xf32, #tpu.memory_space<vmem>>, %arg7: memref<1x32xf32, #tpu.memory_space<vmem>>, %arg8: memref<32x4xf32, #tpu.memory_space<vmem>>, %arg9: memref<1x4xf32, #tpu.memory_space<vmem>>, %arg10: memref<8x4xf32, #tpu.memory_space<vmem>>) attributes {dimension_semantics = [#tpu.dimension_semantics<parallel>], iteration_bounds = array<i64: 1>, scalar_prefetch = 0 : i64, scratch_operands = 0 : i64, tpu.core_type = #tpu.core_type<tc>, window_params = [{transform_indices = @transform_0, window_bounds = array<i64: 8, 16>}, {pipeline_mode = #tpu.pipeline_mode<synchronous>, transform_indices = @transform_1, window_bounds = array<i64: 16, 128>}, {pipeline_mode = #tpu.pipeline_mode<synchronous>, transform_indices = @transform_2, window_bounds = array<i64: 1, 128>}, {pipeline_mode = #tpu.pipeline_mode<synchronous>, transform_indices = @transform_3, window_bounds = array<i64: 128, 64>}, {pipeline_mode = #tpu.pipeline_mode<synchronous>, transform_indices = @transform_4, window_bounds = array<i64: 1, 64>}, {pipeline_mode = #tpu.pipeline_mode<synchronous>, transform_indices = @transform_5, window_bounds = array<i64: 64, 32>}, {pipeline_mode = #tpu.pipeline_mode<synchronous>, transform_indices = @transform_6, window_bounds = array<i64: 1, 32>}, {pipeline_mode = #tpu.pipeline_mode<synchronous>, transform_indices = @transform_7, window_bounds = array<i64: 32, 4>}, {pipeline_mode = #tpu.pipeline_mode<synchronous>, transform_indices = @transform_8, window_bounds = array<i64: 1, 4>}, {transform_indices = @transform_9, window_bounds = array<i64: 8, 4>}]} {
    %c0 = arith.constant 0 : index
    %c0_0 = arith.constant 0 : index
    %0 = vector.load %arg1[%c0, %c0_0] : memref<8x16xf32, #tpu.memory_space<vmem>>, vector<8x16xf32>
    %c0_1 = arith.constant 0 : index
    %c0_2 = arith.constant 0 : index
    %1 = vector.load %arg2[%c0_1, %c0_2] : memref<16x128xf32, #tpu.memory_space<vmem>>, vector<16x128xf32>
    %cst = arith.constant dense<0.000000e+00> : vector<8x128xf32>
    %2 = tpu.matmul %0, %1, %cst {dimension_numbers = #tpu.dot_dimension_numbers<[1], [0], [0], [1], [0, 0, 1, 1], [], []>} : vector<8x16xf32>, vector<16x128xf32>, vector<8x128xf32> -> vector<8x128xf32>
    %c0_3 = arith.constant 0 : index
    %c0_4 = arith.constant 0 : index
    %3 = vector.load %arg3[%c0_3, %c0_4] : memref<1x128xf32, #tpu.memory_space<vmem>>, vector<1x128xf32>
    %4 = vector.broadcast %3 : vector<1x128xf32> to vector<8x128xf32>
    %5 = arith.addf %2, %4 : vector<8x128xf32>
    %cst_5 = arith.constant 0.000000e+00 : f32
    %6 = vector.broadcast %cst_5 : f32 to vector<8x128xf32>
    %7 = arith.maximumf %5, %6 : vector<8x128xf32>
    %c0_6 = arith.constant 0 : index
    %c0_7 = arith.constant 0 : index
    %8 = vector.load %arg4[%c0_6, %c0_7] : memref<128x64xf32, #tpu.memory_space<vmem>>, vector<128x64xf32>
    %cst_8 = arith.constant dense<0.000000e+00> : vector<8x64xf32>
    %9 = tpu.matmul %7, %8, %cst_8 {dimension_numbers = #tpu.dot_dimension_numbers<[1], [0], [0], [1], [0, 0, 1, 1], [], []>} : vector<8x128xf32>, vector<128x64xf32>, vector<8x64xf32> -> vector<8x64xf32>
    %c0_9 = arith.constant 0 : index
    %c0_10 = arith.constant 0 : index
    %10 = vector.load %arg5[%c0_9, %c0_10] : memref<1x64xf32, #tpu.memory_space<vmem>>, vector<1x64xf32>
    %11 = vector.broadcast %10 : vector<1x64xf32> to vector<8x64xf32>
    %12 = arith.addf %9, %11 : vector<8x64xf32>
    %cst_11 = arith.constant 0.000000e+00 : f32
    %13 = vector.broadcast %cst_11 : f32 to vector<8x64xf32>
    %14 = arith.maximumf %12, %13 : vector<8x64xf32>
    %c0_12 = arith.constant 0 : index
    %c0_13 = arith.constant 0 : index
    %15 = vector.load %arg6[%c0_12, %c0_13] : memref<64x32xf32, #tpu.memory_space<vmem>>, vector<64x32xf32>
    %cst_14 = arith.constant dense<0.000000e+00> : vector<8x32xf32>
    %16 = tpu.matmul %14, %15, %cst_14 {dimension_numbers = #tpu.dot_dimension_numbers<[1], [0], [0], [1], [0, 0, 1, 1], [], []>} : vector<8x64xf32>, vector<64x32xf32>, vector<8x32xf32> -> vector<8x32xf32>
    %c0_15 = arith.constant 0 : index
    %c0_16 = arith.constant 0 : index
    %17 = vector.load %arg7[%c0_15, %c0_16] : memref<1x32xf32, #tpu.memory_space<vmem>>, vector<1x32xf32>
    %18 = vector.broadcast %17 : vector<1x32xf32> to vector<8x32xf32>
    %19 = arith.addf %16, %18 : vector<8x32xf32>
    %cst_17 = arith.constant 0.000000e+00 : f32
    %20 = vector.broadcast %cst_17 : f32 to vector<8x32xf32>
    %21 = arith.maximumf %19, %20 : vector<8x32xf32>
    %c0_18 = arith.constant 0 : index
    %c0_19 = arith.constant 0 : index
    %22 = vector.load %arg8[%c0_18, %c0_19] : memref<32x4xf32, #tpu.memory_space<vmem>>, vector<32x4xf32>
    %cst_20 = arith.constant dense<0.000000e+00> : vector<8x4xf32>
    %23 = tpu.matmul %21, %22, %cst_20 {dimension_numbers = #tpu.dot_dimension_numbers<[1], [0], [0], [1], [0, 0, 1, 1], [], []>} : vector<8x32xf32>, vector<32x4xf32>, vector<8x4xf32> -> vector<8x4xf32>
    %c0_21 = arith.constant 0 : index
    %c0_22 = arith.constant 0 : index
    %24 = vector.load %arg9[%c0_21, %c0_22] : memref<1x4xf32, #tpu.memory_space<vmem>>, vector<1x4xf32>
    %25 = vector.broadcast %24 : vector<1x4xf32> to vector<8x4xf32>
    %26 = arith.addf %23, %25 : vector<8x4xf32>
    %c0_23 = arith.constant 0 : index
    %c0_24 = arith.constant 0 : index
    %27 = vector.load %arg10[%c0_23, %c0_24] : memref<8x4xf32, #tpu.memory_space<vmem>>, vector<8x4xf32>
    tpu.vector_store %arg10[%c0_23, %c0_24], %26 {strides = array<i32>} : memref<8x4xf32, #tpu.memory_space<vmem>>, vector<8x4xf32>,
    return
  }
  func.func @transform_0(%arg0: i32) -> (i32, i32) {
    %c0_i32 = arith.constant 0 : i32
    %c0_i32_0 = arith.constant 0 : i32
    return %arg0, %c0_i32 : i32, i32
  }
  func.func @transform_1(%arg0: i32) -> (i32, i32) {
    %c0_i32 = arith.constant 0 : i32
    %c0_i32_0 = arith.constant 0 : i32
    %c0_i32_1 = arith.constant 0 : i32
    return %c0_i32, %c0_i32_0 : i32, i32
  }
  func.func @transform_2(%arg0: i32) -> (i32, i32) {
    %c0_i32 = arith.constant 0 : i32
    %c0_i32_0 = arith.constant 0 : i32
    %c0_i32_1 = arith.constant 0 : i32
    return %c0_i32, %c0_i32_0 : i32, i32
  }
  func.func @transform_3(%arg0: i32) -> (i32, i32) {
    %c0_i32 = arith.constant 0 : i32
    %c0_i32_0 = arith.constant 0 : i32
    %c0_i32_1 = arith.constant 0 : i32
    return %c0_i32, %c0_i32_0 : i32, i32
  }
  func.func @transform_4(%arg0: i32) -> (i32, i32) {
    %c0_i32 = arith.constant 0 : i32
    %c0_i32_0 = arith.constant 0 : i32
    %c0_i32_1 = arith.constant 0 : i32
    return %c0_i32, %c0_i32_0 : i32, i32
  }
  func.func @transform_5(%arg0: i32) -> (i32, i32) {
    %c0_i32 = arith.constant 0 : i32
    %c0_i32_0 = arith.constant 0 : i32
    %c0_i32_1 = arith.constant 0 : i32
    return %c0_i32, %c0_i32_0 : i32, i32
  }
  func.func @transform_6(%arg0: i32) -> (i32, i32) {
    %c0_i32 = arith.constant 0 : i32
    %c0_i32_0 = arith.constant 0 : i32
    %c0_i32_1 = arith.constant 0 : i32
    return %c0_i32, %c0_i32_0 : i32, i32
  }
  func.func @transform_7(%arg0: i32) -> (i32, i32) {
    %c0_i32 = arith.constant 0 : i32
    %c0_i32_0 = arith.constant 0 : i32
    %c0_i32_1 = arith.constant 0 : i32
    return %c0_i32, %c0_i32_0 : i32, i32
  }
  func.func @transform_8(%arg0: i32) -> (i32, i32) {
    %c0_i32 = arith.constant 0 : i32
    %c0_i32_0 = arith.constant 0 : i32
    %c0_i32_1 = arith.constant 0 : i32
    return %c0_i32, %c0_i32_0 : i32, i32
  }
  func.func @transform_9(%arg0: i32) -> (i32, i32) {
    %c0_i32 = arith.constant 0 : i32
    %c0_i32_0 = arith.constant 0 : i32
    return %arg0, %c0_i32 : i32, i32
  }
}

</mosaic_0001>

<bundles_post_ra>
// kernel: dqn_forward.1
= control target key start
LH: loop header
LB: loop body
LE: loop exit
PB: predicated region body
PF: predicated region fallthrough
CT: control target
= control target key end

     0   :  { %v553_v0 = vmov 0.0|0.0   ;;  %vm554_vm0 = vmmov 0   ;;  %v555_v3 = vmov 0.0   ;;  %vm42_vm1 = vcmask 130048   ;;  %s737_s1 = inlined_call_operand.vmem [shape: f32[16,128], index: 1, kind: input, shape index: {}]   ;;  %s738_s3 = inlined_call_operand.vmem [shape: f32[128,64], index: 3, kind: input, shape index: {}]   ;;  %s739_s0 = inlined_call_operand.vmem [shape: f32[8,16], index: 0, kind: input, shape index: {}]   ;;  %s740_s5 = inlined_call_operand.vmem [shape: f32[64,32], index: 5, kind: input, shape index: {}]   ;;  %s741_s2 = inlined_call_operand.vmem [shape: f32[1,128], index: 2, kind: input, shape index: {}]   ;;  %s742_s4 = inlined_call_operand.vmem [shape: f32[1,64], index: 4, kind: input, shape index: {}]   ;;  %s743_s7 = inlined_call_operand.vmem [shape: f32[32,4], index: 7, kind: input, shape index: {}]   ;;  %s744_s6 = inlined_call_operand.vmem [shape: f32[1,32], index: 6, kind: input, shape index: {}]   ;;  %s745_s8 = inlined_call_operand.vmem [shape: f32[1,4], index: 8, kind: input, shape index: {}]   ;;  %s746_s9 = inlined_call_operand.vmem [shape: f32[8,4], index: 9, kind: output, shape index: {}]  }
   0x1   :  { %505 = vmatprep.subr.bf16.mxu0 %v553_v0  ;;  %v33_v1 = vld [vmem:[%s737_s1] sm:$0xff]  ;;  %v34_v2 = vld [vmem:[%s737_s1 + $0x8] sm:$0xff]  ;;  %437 = vmatprep.mubr.msk.f32.mxu0 %vm554_vm0, %v555_v3  ;;  %v119_v7 = vld [vmem:[%s738_s3 + $0x10] sm:$0xff]  ;;  %vm226_vm2 = vcmask 523264   ;;  %vm312_vm3 = vcmask 261120   ;;  %vm386_vm4 = vcmask 31744  }
   0x2   :  { %v506_v4 = vpack.c.bf16 %v34_v2, %v33_v1  ;;  %508 = vmatprep.subr.bf16.mxu1 %v553_v0  ;;  %v117_v5 = vld [vmem:[%s738_s3] sm:$0xff]  ;;  %v118_v6 = vld [vmem:[%s738_s3 + $0x8] sm:$0xff]  ;;  %472 = vmatprep.mubr.msk.f32.mxu1 %vm554_vm0, %v555_v3  ;;  %v120_v9 = vld [vmem:[%s738_s3 + $0x18] sm:$0xff] }
   0x3   :  { %v509_v8 = vpack.c.bf16 %v118_v6, %v117_v5  ;;  %v32_v10 = vld [vmem:[%s739_s0] sm:$0xff]  ;;  %v512_v11 = vpack.c.bf16 %v120_v9, %v119_v7  ;;  %v122_v13 = vld [vmem:[%s738_s3 + $0x28] sm:$0xff]  ;;  %v123_v15 = vld [vmem:[%s738_s3 + $0x30] sm:$0xff] }
   0x4   :  { %507 = vmatpush3.bf16.msra.mxu0 %v506_v4  ;;  %v121_v12 = vld [vmem:[%s738_s3 + $0x20] sm:$0xff]  ;;  %v124_v16 = vld [vmem:[%s738_s3 + $0x38] sm:$0xff]  ;;  %v126_v19 = vld [vmem:[%s738_s3 + $0x48] sm:$0xff] }
   0x5   :  { %510 = vmatpush3.bf16.msra.mxu1 %v509_v8  ;;  %532 = vmatprep.subr.bf16.mxu0 %v553_v0  ;;  %v515_v14 = vpack.c.bf16 %v122_v13, %v121_v12  ;;  %v518_v17 = vpack.c.bf16 %v124_v16, %v123_v15  ;;  %v125_v18 = vld [vmem:[%s738_s3 + $0x40] sm:$0xff]  ;;  %v127_v21 = vld [vmem:[%s738_s3 + $0x50] sm:$0xff]  ;;  %v128_v22 = vld [vmem:[%s738_s3 + $0x58] sm:$0xff] }
   0x6   :  { %511 = vmatprep.subr.bf16.mxu1 %v553_v0  ;;  %v521_v20 = vpack.c.bf16 %v126_v19, %v125_v18  ;;  %v524_v23 = vpack.c.bf16 %v128_v22, %v127_v21  ;;  %v129_v24 = vld [vmem:[%s738_s3 + $0x60] sm:$0xff]  ;;  %v130_v25 = vld [vmem:[%s738_s3 + $0x68] sm:$0xff]  ;;  %v131_v27 = vld [vmem:[%s738_s3 + $0x70] sm:$0xff] }
   0x7   :  { %438 = vmatmul.mubr.msk.f32.vlgmr.msra.gmra.mrb[0].mxu0 %vm42_vm1, %v32_v10  ;;  %v527_v26 = vpack.c.bf16 %v130_v25, %v129_v24  ;;  %v132_v28 = vld [vmem:[%s738_s3 + $0x78] sm:$0xff]  ;;  %v211_v30 = vld [vmem:[%s740_s5] sm:$0xff]  ;;  %v212_v31 = vld [vmem:[%s740_s5 + $0x8] sm:$0xff] }
   0x8   :  { %491 = vmatprep.mubr.msk.f32.mxu0 %vm554_vm0, %v555_v3  ;;  %v530_v29 = vpack.c.bf16 %v132_v28, %v131_v27  ;;  %v213_v32 = vld [vmem:[%s740_s5 + $0x10] sm:$0xff]  ;;  %v533_v33 = vpack.c.bf16 %v212_v31, %v211_v30  ;;  %v214_v34 = vld [vmem:[%s740_s5 + $0x18] sm:$0xff]  ;;  %v215_v36 = vld [vmem:[%s740_s5 + $0x20] sm:$0xff] }
   0x9   :  { %513 = vmatpush3.bf16.msra.mxu1 %v512_v11  ;;  %v536_v35 = vpack.c.bf16 %v214_v34, %v213_v32  ;;  %v216_v37 = vld [vmem:[%s740_s5 + $0x28] sm:$0xff]  ;;  %v392_v39 = vld [vmem:[%s741_s2] ss:$0 sm:$0xff]  ;;  %v217_v44 = vld [vmem:[%s740_s5 + $0x30] sm:$0xff] }
   0xa   :  { %514 = vmatprep.subr.bf16.mxu1 %v553_v0  ;;  %534 = vmatpush3.bf16.msra.mxu0 %v533_v33  ;;  %v539_v38 = vpack.c.bf16 %v216_v37, %v215_v36  ;;  %v218_v45 = vld [vmem:[%s740_s5 + $0x38] sm:$0xff]  ;;  %v394_v47 = vld [vmem:[%s742_s4] ss:$0 sm:$0xff]  ;;  %v302_v49 = vld [vmem:[%s743_s7 + $0x8] sm:$0xff] }
   0xb   :  { %535 = vmatprep.subr.bf16.mxu0 %v553_v0  ;;  %v542_v46 = vpack.c.bf16 %v218_v45, %v217_v44  ;;  %v301_v48 = vld [vmem:[%s743_s7] sm:$0xff]  ;;  %v303_v55 = vld [vmem:[%s743_s7 + $0x10] sm:$0xff]  ;;  %v304_v56 = vld [vmem:[%s743_s7 + $0x18] sm:$0xff] }
   0xc   :  { %v545_v53 = vpack.c.bf16 %v302_v49, %v301_v48  ;;  %v548_v57 = vpack.c.bf16 %v304_v56, %v303_v55  ;;  %v395_v58 = vld [vmem:[%s744_s6] ss:$0 sm:$0xff] }
   0xd   :  { %516 = vmatpush3.bf16.msra.mxu1 %v515_v14  ;;  %v397_v63 = vld [vmem:[%s745_s8] ss:$0 sm:$0xff] }
   0xe   :  { %517 = vmatprep.subr.bf16.mxu1 %v553_v0  ;;  %537 = vmatpush3.bf16.msra.mxu0 %v536_v35 }
   0xf   :  { %538 = vmatprep.subr.bf16.mxu0 %v553_v0 }
  0x11   :  { %519 = vmatpush3.bf16.msra.mxu1 %v518_v17 }
  0x12   :  { %520 = vmatprep.subr.bf16.mxu1 %v553_v0  ;;  %540 = vmatpush3.bf16.msra.mxu0 %v539_v38 }
  0x13   :  { %541 = vmatprep.subr.bf16.mxu0 %v553_v0 }
  0x15   :  { %522 = vmatpush3.bf16.msra.mxu1 %v521_v20 }
  0x16   :  { %523 = vmatprep.subr.bf16.mxu1 %v553_v0  ;;  %543 = vmatpush3.bf16.msra.mxu0 %v542_v46 }
  0x17   :  { %544 = vmatprep.subr.bf16.mxu0 %v553_v0 }
  0x19   :  { %525 = vmatpush3.bf16.msra.mxu1 %v524_v23 }
  0x1a   :  { %526 = vmatprep.subr.bf16.mxu1 %v553_v0 }
  0x1d   :  { %528 = vmatpush3.bf16.msra.mxu1 %v527_v26 }
  0x1e   :  { %529 = vmatprep.subr.bf16.mxu1 %v553_v0 }
  0x21   :  { %531 = vmatpush3.bf16.msra.mxu1 %v530_v29 }
  0xda   :  { %v112_v40 = vpop.f32.mrb[0].mxu0 }
  0xdb   :  { %v113_v41 = vadd.f32 %v392_v39, %v112_v40  ;;  %v439_v42 = vpop.f32.mrb[1].mxu0 }
  0xdd   :  { %v116_v43 = vmax.f32 %v113_v41, 0.0 }
  0xdf   :  { %473 = vmatmul.mubr.f32.vlgmr.msra.gmra.mrb[0].mxu1 %v116_v43 }
 0x1b2   :  { %v206_v50 = vpop.f32.mrb[0].mxu1 }
 0x1b3   :  { %v207_v51 = vadd.f32 %v394_v47, %v206_v50  ;;  %v474_v52 = vpop.f32.mrb[1].mxu1 }
 0x1b5   :  { %v210_v54 = vmax.f32 %v207_v51, 0.0 }
 0x1b7   :  { %492 = vmatmul.mubr.msk.f32.vlgmr.msra.gmra.mrb[2].mxu0 %vm226_vm2, %v210_v54 }
 0x1b8   :  { %546 = vmatpush3.bf16.msra.mxu0 %v545_v53  ;;  %502 = vmatprep.mubr.msk.f32.mxu0 %vm554_vm0, %v555_v3 }
 0x1b9   :  { %547 = vmatprep.subr.bf16.mxu0 %v553_v0 }
 0x1bc   :  { %549 = vmatpush3.bf16.msra.mxu0 %v548_v57 }
 0x28a   :  { %v296_v59 = vpop.f32.mrb[2].mxu0 }
 0x28b   :  { %v297_v60 = vadd.f32 %v395_v58, %v296_v59  ;;  %v493_v61 = vpop.f32.mrb[3].mxu0 }
 0x28d   :  { %v300_v62 = vmax.f32 %v297_v60, 0.0 }
 0x28f   :  { %503 = vmatmul.mubr.msk.f32.vlgmr.msra.gmra.mrb[4].mxu0 %vm312_vm3, %v300_v62 }
 0x362   :  { %v382_v0 = vpop.f32.mrb[4].mxu0 }
 0x363   :  { %v383_v1 = vadd.f32 %v397_v63, %v382_v0  ;;  %v504_v2 = vpop.f32.mrb[5].mxu0 }
 0x365   :  { %387 = vst.msk [vmem:[%s746_s9] sm:$0xff] %vm386_vm4, %v383_v1 }

</bundles_post_ra>
